<compile_context>
chip_gen: v7x
topology: tpu7x:2x2x1
jax: 0.10.0
libtpu: 0.0.40
codegen_flags: <defaults>
</compile_context>

<pallas_src>
import jax
import jax.numpy as jnp
from jax.experimental import pallas as pl
from jax.experimental.pallas import tpu as pltpu

HIDDEN = 1024        # fixed by nn.Linear(1024, 2048)
INTERMEDIATE = 2048  # fixed by nn.Linear(1024, 2048)
NUM_LABELS = 4       # config.num_labels (synthetic choice)
L_PAD = 128          # lane-dense padded label dim
TILE_N = 256         # tile of the intermediate (2048) dimension


def _head_kernel(feat_ref, w1_ref, b1_ref, w2_ref, o_ref):
    # feat_ref: [B, S, HIDDEN] f32   (constant block index -> resident in VMEM)
    # w1_ref:   [HIDDEN, TILE_N] bf16
    # b1_ref:   [1, TILE_N]      f32
    # w2_ref:   [TILE_N, L_PAD]  bf16
    # o_ref:    [1, B, L_PAD]    f32   (per-tile partial of the second matmul)
    x = feat_ref[:, 0, :].astype(jnp.bfloat16)              # CLS token [B, HIDDEN]
    h = jnp.dot(x, w1_ref[...], preferred_element_type=jnp.float32)
    h = jnp.maximum(h + b1_ref[...], 0.0)                   # [B, TILE_N]
    p = jnp.dot(h.astype(jnp.bfloat16), w2_ref[...],
                preferred_element_type=jnp.float32)         # [B, L_PAD]
    o_ref[...] = p[None].astype(o_ref.dtype)


def roberta_classification_head(features, w1_bf16, b1, w2_pad_bf16, b2):
    """features: [B, S, HIDDEN] f32 -> logits [B, NUM_LABELS] f32."""
    B, S, H = features.shape
    num_tiles = INTERMEDIATE // TILE_N

    cost = pl.CostEstimate(
        flops=2 * B * H * INTERMEDIATE + 2 * B * INTERMEDIATE * L_PAD,
        transcendentals=0,
        bytes_accessed=(B * S * H * 4              # features (f32)
                        + H * INTERMEDIATE * 2     # W1 (bf16)
                        + INTERMEDIATE * 4         # b1 (f32)
                        + INTERMEDIATE * L_PAD * 2 # W2 padded (bf16)
                        + num_tiles * B * L_PAD * 4),
    )

    partials = pl.pallas_call(
        _head_kernel,
        out_shape=jax.ShapeDtypeStruct((num_tiles, B, L_PAD), jnp.float32),
        grid_spec=pltpu.PrefetchScalarGridSpec(
            num_scalar_prefetch=0,
            grid=(num_tiles,),
            in_specs=[
                pl.BlockSpec((B, S, H), lambda n: (0, 0, 0)),        # features
                pl.BlockSpec((H, TILE_N), lambda n: (0, n)),         # W1 tile
                pl.BlockSpec((1, TILE_N), lambda n: (0, n)),         # b1 tile
                pl.BlockSpec((TILE_N, L_PAD), lambda n: (n, 0)),     # W2 tile
            ],
            out_specs=pl.BlockSpec((1, B, L_PAD), lambda n: (n, 0, 0)),
        ),
        compiler_params=pltpu.CompilerParams(
            dimension_semantics=("parallel",),   # shards N-tiles across TCs on v7x
            vmem_limit_bytes=8 << 20,
        ),
        cost_estimate=cost,
    )(features, w1_bf16, b1, w2_pad_bf16)

    # Tiny epilogue (fused by XLA under jit): combine partials, add bias, slice.
    logits = partials.sum(axis=0)[:, :NUM_LABELS] + b2
    return logits


def _reference(features, w1_bf16, b1, w2_pad_bf16, b2):
    # Pure-JAX reference mirroring the kernel's bf16 quantization of
    # x / W1 / h / W2, computed with plain f32 matmuls.
    x = features[:, 0, :].astype(jnp.bfloat16).astype(jnp.float32)
    h = jnp.maximum(x @ w1_bf16.astype(jnp.float32) + b1, 0.0)
    h = h.astype(jnp.bfloat16).astype(jnp.float32)
    out = h @ w2_pad_bf16.astype(jnp.float32)
    return out[:, :NUM_LABELS] + b2


if __name__ == "__main__":
    key = jax.random.PRNGKey(0)
    k_feat, k_w1, k_b1, k_w2, k_b2 = jax.random.split(key, 5)

    B, S = 2, 8
    features = jax.random.normal(k_feat, (B, S, HIDDEN), dtype=jnp.float32)

    # Deterministic synthetic parameters ([in, out] layout, i.e. torch W.T).
    w1 = jax.random.normal(k_w1, (HIDDEN, INTERMEDIATE), dtype=jnp.float32) * 0.02
    b1 = jax.random.normal(k_b1, (1, INTERMEDIATE), dtype=jnp.float32) * 0.02
    w2 = jax.random.normal(k_w2, (INTERMEDIATE, NUM_LABELS), dtype=jnp.float32) * 0.02
    b2 = jax.random.normal(k_b2, (1, NUM_LABELS), dtype=jnp.float32) * 0.02

    # Kernel-side weight packing: bf16 weights; W2 zero-padded to 128 lanes.
    w1_bf16 = w1.astype(jnp.bfloat16)
    w2_pad = jnp.zeros((INTERMEDIATE, L_PAD), jnp.float32).at[:, :NUM_LABELS].set(w2)
    w2_pad_bf16 = w2_pad.astype(jnp.bfloat16)

    head = jax.jit(roberta_classification_head)
    out = head(features, w1_bf16, b1, w2_pad_bf16, b2)
    out = jax.block_until_ready(out)

    ref = _reference(features, w1_bf16, b1, w2_pad_bf16, b2)
    assert out.shape == (B, NUM_LABELS), out.shape
    assert jnp.allclose(out, ref, atol=2e-3, rtol=2e-3), (out, ref)

    print("KERNEL_OK")
</pallas_src>

<mosaic_0001>
module attributes {stable_mosaic.version = 11 : i64} {
  func.func @_head_kernel(%arg0: i32, %arg1: memref<2x8x1024xf32, #tpu.memory_space<vmem>>, %arg2: memref<1024x256xbf16, #tpu.memory_space<vmem>>, %arg3: memref<1x256xf32, #tpu.memory_space<vmem>>, %arg4: memref<256x128xbf16, #tpu.memory_space<vmem>>, %arg5: memref<1x2x128xf32, #tpu.memory_space<vmem>>) attributes {dimension_semantics = [#tpu.dimension_semantics<parallel>], iteration_bounds = array<i64: 8>, scalar_prefetch = 0 : i64, scratch_operands = 0 : i64, tpu.core_type = #tpu.core_type<tc>, window_params = [{pipeline_mode = #tpu.pipeline_mode<synchronous>, transform_indices = @transform_0, window_bounds = array<i64: 2, 8, 1024>}, {transform_indices = @transform_1, window_bounds = array<i64: 1024, 256>}, {transform_indices = @transform_2, window_bounds = array<i64: 1, 256>}, {transform_indices = @transform_3, window_bounds = array<i64: 256, 128>}, {transform_indices = @transform_4, window_bounds = array<i64: 1, 2, 128>}]} {
    %c0 = arith.constant 0 : index
    %c0_0 = arith.constant 0 : index
    %c0_1 = arith.constant 0 : index
    %0 = vector.load %arg1[%c0, %c0_0, %c0_1] : memref<2x8x1024xf32, #tpu.memory_space<vmem>>, vector<2x1x1024xf32>
    %1 = vector.shape_cast %0 : vector<2x1x1024xf32> to vector<2x1024xf32>
    %2 = arith.truncf %1 : vector<2x1024xf32> to vector<2x1024xbf16>
    %c0_2 = arith.constant 0 : index
    %c0_3 = arith.constant 0 : index
    %3 = vector.load %arg2[%c0_2, %c0_3] : memref<1024x256xbf16, #tpu.memory_space<vmem>>, vector<1024x256xbf16>
    %cst = arith.constant dense<0.000000e+00> : vector<2x256xf32>
    %4 = tpu.matmul %2, %3, %cst {dimension_numbers = #tpu.dot_dimension_numbers<[1], [0], [0], [1], [0, 0, 1, 1], [], []>} : vector<2x1024xbf16>, vector<1024x256xbf16>, vector<2x256xf32> -> vector<2x256xf32>
    %c0_4 = arith.constant 0 : index
    %c0_5 = arith.constant 0 : index
    %5 = vector.load %arg3[%c0_4, %c0_5] : memref<1x256xf32, #tpu.memory_space<vmem>>, vector<1x256xf32>
    %6 = vector.broadcast %5 : vector<1x256xf32> to vector<2x256xf32>
    %7 = arith.addf %4, %6 : vector<2x256xf32>
    %cst_6 = arith.constant 0.000000e+00 : f32
    %8 = vector.broadcast %cst_6 : f32 to vector<2x256xf32>
    %9 = arith.maximumf %7, %8 : vector<2x256xf32>
    %10 = arith.truncf %9 : vector<2x256xf32> to vector<2x256xbf16>
    %c0_7 = arith.constant 0 : index
    %c0_8 = arith.constant 0 : index
    %11 = vector.load %arg4[%c0_7, %c0_8] : memref<256x128xbf16, #tpu.memory_space<vmem>>, vector<256x128xbf16>
    %cst_9 = arith.constant dense<0.000000e+00> : vector<2x128xf32>
    %12 = tpu.matmul %10, %11, %cst_9 {dimension_numbers = #tpu.dot_dimension_numbers<[1], [0], [0], [1], [0, 0, 1, 1], [], []>} : vector<2x256xbf16>, vector<256x128xbf16>, vector<2x128xf32> -> vector<2x128xf32>
    %13 = vector.shape_cast %12 : vector<2x128xf32> to vector<1x2x128xf32>
    %c0_10 = arith.constant 0 : index
    %c0_11 = arith.constant 0 : index
    %c0_12 = arith.constant 0 : index
    %14 = vector.load %arg5[%c0_10, %c0_11, %c0_12] : memref<1x2x128xf32, #tpu.memory_space<vmem>>, vector<1x2x128xf32>
    tpu.vector_store %arg5[%c0_10, %c0_11, %c0_12], %13 {strides = array<i32>} : memref<1x2x128xf32, #tpu.memory_space<vmem>>, vector<1x2x128xf32>,
    return
  }
  func.func @transform_0(%arg0: i32) -> (i32, i32, i32) {
    %c0_i32 = arith.constant 0 : i32
    %c0_i32_0 = arith.constant 0 : i32
    %c0_i32_1 = arith.constant 0 : i32
    %c0_i32_2 = arith.constant 0 : i32
    return %c0_i32, %c0_i32_0, %c0_i32_1 : i32, i32, i32
  }
  func.func @transform_1(%arg0: i32) -> (i32, i32) {
    %c0_i32 = arith.constant 0 : i32
    %c0_i32_0 = arith.constant 0 : i32
    return %c0_i32, %arg0 : i32, i32
  }
  func.func @transform_2(%arg0: i32) -> (i32, i32) {
    %c0_i32 = arith.constant 0 : i32
    %c0_i32_0 = arith.constant 0 : i32
    return %c0_i32, %arg0 : i32, i32
  }
  func.func @transform_3(%arg0: i32) -> (i32, i32) {
    %c0_i32 = arith.constant 0 : i32
    %c0_i32_0 = arith.constant 0 : i32
    return %arg0, %c0_i32 : i32, i32
  }
  func.func @transform_4(%arg0: i32) -> (i32, i32, i32) {
    %c0_i32 = arith.constant 0 : i32
    %c0_i32_0 = arith.constant 0 : i32
    %c0_i32_1 = arith.constant 0 : i32
    return %arg0, %c0_i32, %c0_i32_0 : i32, i32, i32
  }
}

</mosaic_0001>

<bundles_post_ra>
// kernel: roberta_classification_head.1
= control target key start
LH: loop header
LB: loop body
LE: loop exit
PB: predicated region body
PF: predicated region fallthrough
CT: control target
= control target key end

     0   :  { %9 = vsyncpa [#allocation3], 0  ;;  %s2828_s0 = inlined_call_operand.hbm [shape: f32[2,8,1024], index: 0, kind: input, shape index: {}]   ;;  %s2829_s1 = inlined_call_operand.hbm [shape: bf16[1024,2048], index: 1, kind: input, shape index: {}]   ;;  %s2830_s2 = inlined_call_operand.hbm [shape: f32[1,2048], index: 2, kind: input, shape index: {}]   ;;  %s2831_s3 = inlined_call_operand.hbm [shape: bf16[2048,128], index: 3, kind: input, shape index: {}]   ;;  %s2832_s4 = inlined_call_operand.vmem [shape: f32[8,2,128], index: 4, kind: output, shape index: {}]  }
   0x1   :  { %10 = vsyncpa [#allocation5], 0 }
   0x2   :  { %12 = vsyncpa [#allocation5 + $0x1], 0 }
   0x3   :  { %13 = vsyncpa [#allocation8], 0 }
   0x4   :  { %15 = vsyncpa [#allocation8 + $0x1], 0  ;;  %s2388_s15 = smov 0   ;;  %s2390_s16 = smov 0  }
   0x5   :  { %s2392_s17 = smov 0   ;;  %s2394_s18 = smov 0  }
   0x6 LB: > { %s2409_s19 = sadd.s32 1, %s2352_s18   ;;  %s49_s20 = sadd.s32 1, %s2348_s17  ;;  %s2352_s18 = sphi %s2394_s18, %s2856_s18   ;;  %s2348_s17 = sphi %s2392_s17, %s2855_s17   ;;  %s2344_s16 = sphi %s2390_s16, %s2854_s16   ;;  %s2340_s15 = sphi %s2388_s15, %s2853_s15  }
   0x7   : > { %s46_s21 = ssub.s32 %s2352_s18, %s2409_s19  ;;  %p56_p0 = scmp.ne.s32.totalorder %s2348_s17, %s2344_s16 }
   0x8   : > { %p47_p1 = scmp.eq.s32.totalorder %s46_s21, 0  ;;  %p57_p2 = scmp.eq.s32.totalorder %s2352_s18, 0 }
   0x9   : > { %p1944_p4 = scmp.lt.s32.totalorder %s2352_s18, 8  ;;  %s177_s23 = sand.u32 1, %s2352_s18  }
   0xa   : > { %s2418_s22 = scalar_select %p47_p1, %s2348_s17, %s49_s20  }
   0xb   : > { %p58_p3 = por %p57_p2, %p56_p0  ;;  %s2423_s24 = sand.u32 1, %s2348_s17  }
   0xc   : > { %s1721_s25 = sshll.u32 %s2423_s24, 10  ;;  %s1882_s26 = sshll.u32 %s2352_s18, 7 }
   0xd   : > { %s2430_s29 = scalar_lea.hbm %s2829_s1, %s1882_s26  ;;  %s181_s30 = scalar_lea.vmem [#allocation4], %s1721_s25 }
   0xe   : > { %s188_s5 = sshll.u32 %s181_s30, 4  ;;  %p2434_p5 = pnand %p1944_p4, %p58_p3  ;;  %s2432_s5 = int_to_ptr.vmem [resolvable:$true] %s188_s5 }
   0xf   : > { %s2438_s7 = scalar_lea.sflag [#allocation5], %s177_s23  ;;  %s2192_s8 = scalar_lea.hbm %s2430_s29, 16384 }
  0x10   : > { %s2841_s6 = scalar_select %p2434_p5, 1, 0 }
  0x11   : > { %p2193_p6 = scmp.ne.s32.totalorder %s2430_s29, %s2192_s8  ;;  %p2444_p7 = pneg %p2434_p5 }
  0x12   : > { %s2197_s12 = scalar_lea.hbm %s2829_s1, 131072  ;;  %p2198_p10 = scmp.lt.u32.totalorder %s2430_s29, %s2829_s1 }
  0x13   : > { %s2842_s9 = scalar_select %p2444_p7, 1, 0 }
  0x14   : > { %p2195_p8 = pnand %p2444_p7, %p2193_p6  ;;  %p2199_p11 = scmp.lt.u32.totalorder %s2197_s12, %s2192_s8 }
  0x15   : > { %p2201_p13 = scmp.lt.u32.totalorder %s2192_s8, %s2430_s29 }
  0x16   : > { %p2196_p9 = pneg %p2195_p8  ;;  %p2200_p12 = por %p2199_p11, %p2198_p10 }
  0x18   : > { %p2202_p0 = por %p2201_p13, %p2200_p12 }
  0x1a   : > { %p2203_p1 = pnand %p2202_p0, %p2196_p9 }
  0x1c   : > { %2206 = shalt.err (!%p2203_p1)
}
  0x1d   : > { %s2207_s20 = scalar_lea.vmem %s2432_s5, 16384  ;;  %s2354_s21 = smov [#allocation4]  }
  0x1e   : > { %p2208_p2 = scmp.ne.s32.totalorder %s2432_s5, %s2207_s20  ;;  %s2212_s23 = sshll.u32 %s2354_s21, 4  ;;  %s2213_s23 = int_to_ptr.vmem [resolvable:$false] %s2212_s23 }
  0x1f   : > { %s2214_s25 = scalar_lea.vmem %s2213_s23, 32768  ;;  %p2215_p6 = scmp.lt.s32.totalorder %s2432_s5, %s2213_s23 }
  0x20   : > { %p2210_p3 = pnand %p2208_p2, %p2444_p7  ;;  %p2216_p8 = scmp.lt.s32.totalorder %s2214_s25, %s2207_s20 }
  0x22   : > { %p2211_p4 = pneg %p2210_p3  ;;  %p2217_p10 = por %p2216_p8, %p2215_p6 }
  0x24   : > { %p2218_p11 = pnand %p2217_p10, %p2211_p4 }
  0x26   : > { %2221 = shalt.err (!%p2218_p11)
}
  0x27   : > { %s2833_s26 = smov 1024   ;;  %s2356_s27 = smov 128  }
  0x28   : > { %s2357_s28 = smov 8   ;;  %s2470_s30 = sadd.s32 4294967295, %s2352_s18  }
  0x29   : > { %1936 = dma.hbm_to_vmem [thread:$0]  (!%p2434_p5), %s2430_s29, 16384, %s2432_s5, %s2438_s7, %s2833_s26, %s2356_s27, %s2357_s28  }
  0x2a   : > { %p62_p9 = scmp.ne.s32.totalorder %s2344_s16, %s2340_s15  ;;  %p2834_p12 = scmp.eq.s32.totalorder %s2470_s30, 0 }
  0x2b   : > { %p1718_p13 = scmp.ge.s32.totalorder %s2352_s18, 1  ;;  %p151_p0 = scmp.lt.s32.totalorder %s2352_s18, 9 }
  0x2c   : > { %p2479_p1 = por %p2834_p12, %p62_p9  ;;  %s2358_s29 = smov [#allocation2]  }
  0x2d   : > { %p2483_p2 = pnand %p1718_p13, %p151_p0  ;;  %s163_s5 = sshll.u32 %s2358_s29, 4  ;;  %s2489_s5 = int_to_ptr.vmem [resolvable:$true] %s163_s5 }
  0x2e   : > { %s2843_s8 = scalar_select %p2479_p1, 1, 0 }
  0x2f   : > { %s2844_s10 = scalar_select %p2483_p2, 1, 0 }
  0x30   : > { %p1929_p3 = pneg %p2483_p2  ;;  %s1724_s15 = sshll.u32 %s2423_s24, 1 }
  0x31   : > { %s1883_s11 = sshll.u32 %s2352_s18, 5  ;;  %s202_s21 = scalar_lea.vmem [#allocation6], %s1724_s15 }
  0x32   : > { %p2495_p4 = pnand %p1929_p3, %p2834_p12  ;;  %s2502_s20 = scalar_lea.hbm %s2830_s2, %s1883_s11 }
  0x33   : > { %s210_s23 = sshll.u32 %s202_s21, 4  ;;  %s2222_s28 = scalar_lea.hbm %s2828_s0, 2048  ;;  %s2504_s23 = int_to_ptr.vmem [resolvable:$true] %s210_s23 }
  0x34   : > { %p2223_p6 = scmp.ne.s32.totalorder %s2828_s0, %s2222_s28  ;;  %p2224_p8 = pneg %p2495_p4 }
  0x35   : > { %p2229_p9 = scmp.lt.u32.totalorder %s2222_s28, %s2828_s0 }
  0x36   : > { %p2225_p10 = pnand %p2224_p8, %p2223_p6 }
  0x38   : > { %p2226_p11 = pneg %p2225_p10 }
  0x3a   : > { %p2231_p13 = pnand %p2229_p9, %p2226_p11 }
  0x3c   : > { %2234 = shalt.err (!%p2231_p13)
}
  0x3d   : > { %s2235_s15 = scalar_lea.vmem %s2489_s5, 2048  ;;  %p2243_p1 = scmp.lt.s32.totalorder %s2489_s5, %s2489_s5 }
  0x3e   : > { %p2236_p0 = scmp.ne.s32.totalorder %s2489_s5, %s2235_s15  ;;  %p2244_p2 = scmp.lt.s32.totalorder %s2235_s15, %s2235_s15 }
  0x40   : > { %p2238_p3 = pnand %p2236_p0, %p2224_p8  ;;  %p2245_p5 = por %p2244_p2, %p2243_p1 }
  0x42   : > { %p2239_p12 = pneg %p2238_p3 }
  0x44   : > { %p2246_p7 = pnand %p2245_p5, %p2239_p12 }
  0x46   : > { %2249 = shalt.err (!%p2246_p7)
}
  0x47   : > { %s2359_s26 = smov 64   ;;  %s2846_s11 = smov 1024  }
  0x48   : > { %1932 = dma.hbm_to_vmem [thread:$0]  (!%p2495_p4), %s2828_s0, 2048, %s2489_s5, [#allocation3], %s2846_s11, %s2846_s11, %s2359_s26  }
  0x49   : > { %s2250_s27 = scalar_lea.hbm %s2502_s20, 32  ;;  %p2847_p5 = scmp.ne.s32.totalorder %s2842_s9, 0 }
  0x4a   : > { %p2251_p1 = scmp.ne.s32.totalorder %s2502_s20, %s2250_s27  ;;  %s2255_s29 = scalar_lea.hbm %s2830_s2, 256 }
  0x4b   : > { %p2256_p2 = scmp.lt.u32.totalorder %s2502_s20, %s2830_s2  ;;  %p2257_p6 = scmp.lt.u32.totalorder %s2255_s29, %s2250_s27 }
  0x4c   : > { %p2253_p7 = pnand %p2251_p1, %p2847_p5  ;;  %p2259_p10 = scmp.lt.u32.totalorder %s2250_s27, %s2502_s20 }
  0x4d   : > { %p2258_p8 = por %p2257_p6, %p2256_p2 }
  0x4e   : > { %p2254_p12 = pneg %p2253_p7 }
  0x4f   : > { %p2260_p11 = por %p2259_p10, %p2258_p8 }
  0x51   : > { %p2261_p9 = pnand %p2260_p11, %p2254_p12 }
  0x53   : > { %2264 = shalt.err (!%p2261_p9)
}
  0x54   : > { %s2265_s5 = scalar_lea.vmem %s2504_s23, 32  ;;  %s2360_s15 = smov [#allocation6]  }
  0x55   : > { %p2266_p4 = scmp.ne.s32.totalorder %s2504_s23, %s2265_s5  ;;  %s2270_s11 = sshll.u32 %s2360_s15, 4  ;;  %s2271_s11 = int_to_ptr.vmem [resolvable:$false] %s2270_s11 }
  0x56   : > { %s2272_s21 = scalar_lea.vmem %s2271_s11, 64  ;;  %p2273_p3 = scmp.lt.s32.totalorder %s2504_s23, %s2271_s11 }
  0x57   : > { %p2268_p13 = pnand %p2266_p4, %p2847_p5  ;;  %p2274_p1 = scmp.lt.s32.totalorder %s2272_s21, %s2265_s5 }
  0x59   : > { %p2269_p0 = pneg %p2268_p13  ;;  %p2275_p7 = por %p2274_p1, %p2273_p3 }
  0x5b   : > { %p2276_p2 = pnand %p2275_p7, %p2269_p0 }
  0x5d   : > { %2279 = shalt.err (!%p2276_p2)
}
  0x5e   : > { %p2848_p12 = scmp.ne.s32.totalorder %s2841_s6, 0  ;;  %s1727_s25 = sshll.u32 %s2423_s24, 7 }
  0x5f   : > { %s1884_s27 = sshll.u32 %s2352_s18, 11  ;;  %s221_s13 = scalar_lea.vmem [#allocation7], %s1727_s25 }
  0x60   : > { %1939 = dma.hbm_to_vmem [thread:$0]  (!%p2848_p12), %s2502_s20, 32, %s2504_s23, %s2438_s7  }
  0x61   : > { %s2557_s29 = scalar_lea.hbm %s2831_s3, %s1884_s27  ;;  %s228_s14 = sshll.u32 %s221_s13, 4  ;;  %s2559_s14 = int_to_ptr.vmem [resolvable:$true] %s228_s14 }
  0x62   : > { %s218_s5 = scalar_lea.sflag [#allocation8], %s2423_s24  ;;  %s2280_s15 = scalar_lea.hbm %s2557_s29, 2048 }
  0x63   : > { %p2281_p6 = scmp.ne.s32.totalorder %s2557_s29, %s2280_s15  ;;  %s2285_s20 = scalar_lea.hbm %s2831_s3, 16384 }
  0x64   : > { %p2286_p11 = scmp.lt.u32.totalorder %s2557_s29, %s2831_s3  ;;  %p2287_p9 = scmp.lt.u32.totalorder %s2285_s20, %s2280_s15 }
  0x65   : > { %p2283_p8 = pnand %p2281_p6, %p2847_p5  ;;  %p2289_p13 = scmp.lt.u32.totalorder %s2280_s15, %s2557_s29 }
  0x66   : > { %p2288_p4 = por %p2287_p9, %p2286_p11 }
  0x67   : > { %p2284_p10 = pneg %p2283_p8 }
  0x68   : > { %p2290_p0 = por %p2289_p13, %p2288_p4 }
  0x6a   : > { %p2291_p3 = pnand %p2290_p0, %p2284_p10 }
  0x6c   : > { %2294 = shalt.err (!%p2291_p3)
}
  0x6d   : > { %s2295_s21 = scalar_lea.vmem %s2559_s14, 2048  ;;  %s2361_s25 = smov [#allocation7]  }
  0x6e   : > { %p2296_p1 = scmp.ne.s32.totalorder %s2559_s14, %s2295_s21  ;;  %s2300_s27 = sshll.u32 %s2361_s25, 4  ;;  %s2301_s27 = int_to_ptr.vmem [resolvable:$false] %s2300_s27 }
  0x6f   : > { %s2302_s28 = scalar_lea.vmem %s2301_s27, 4096  ;;  %p2303_p6 = scmp.lt.s32.totalorder %s2559_s14, %s2301_s27 }
  0x70   : > { %p2298_p7 = pnand %p2296_p1, %p2847_p5  ;;  %p2304_p8 = scmp.lt.s32.totalorder %s2302_s28, %s2295_s21 }
  0x72   : > { %p2299_p2 = pneg %p2298_p7  ;;  %p2305_p11 = por %p2304_p8, %p2303_p6 }
  0x74   : > { %p2306_p9 = pnand %p2305_p11, %p2299_p2 }
  0x76   : > { %2309 = shalt.err (!%p2306_p9)
}
  0x77   : > { %s2362_s12 = smov 4   ;;  %p2849_p5 = scmp.ne.s32.totalorder %s2844_s10, 0 }
  0x78   : > { %1942 = dma.hbm_to_vmem [thread:$0]  (!%p2848_p12), %s2557_s29, 2048, %s2559_s14, %s218_s5, %s2359_s26, %s2359_s26, %s2362_s12  }
  0x79   : > { %240 = sbr.rel (%p2849_p5) target bundleno = 705 (0x2c1), region = 36  ;;  %p2850_p10 = scmp.eq.s32.totalorder (!%p2849_p5), %s2470_s30, 0 }
  0x80   : > { %2327 = dma.done.wait (%p2850_p10), [#allocation3], 2048   ;;  %p2851_p4 = pmov %p2850_p10 }
  0x81   : > { %s246_s6 = sand.u32 1, %s2470_s30   ;;  %s248_s9 = sand.u32 1, %s2344_s16  }
  0x82   : > { %2329 = vsyncadd (%p2851_p4), [#allocation3], 4294965248  ;;  %s1732_s13 = sshll.u32 %s248_s9, 10  ;;  %s247_s15 = scalar_lea.sflag [#allocation5], %s246_s6 }
  0x83   : > { %s2595_s24 = scalar_lea.vmem [#allocation4], %s1732_s13  ;;  %p2852_p13 = scmp.ne.s32.totalorder %s2843_s8, 0 }
  0x85   : > { %2331 = dma.done.wait (%p2852_p13), %s247_s15, 16416  }
  0x86   : > { %2333 = vsyncadd (%p2852_p13), %s247_s15, 4294950880  ;;  %s1733_s10 = sshll.u32 %s248_s9, 1  ;;  %s1734_s26 = sshll.u32 %s248_s9, 7 }
  0x87   : > { %s2601_s29 = scalar_lea.vmem [#allocation6], %s1733_s10  ;;  %s265_s14 = scalar_lea.sflag [#allocation8], %s248_s9 }
  0x88   : > { %s2603_s5 = scalar_lea.vmem [#allocation7], %s1734_s26 }
  0x89   : > { %2335 = dma.done.wait (%p2852_p13), %s265_s14, 2048  }
  0x8a   : > { %2337 = vsyncadd (%p2852_p13), %s265_s14, 4294965248  ;;  %v1984_v0 = vld [vmem:[%s2595_s24 + $0x4] ss:$8 sps:$4 sm:$0xff]   ;;  %v1988_v2 = vld [vmem:[%s2595_s24] ss:$8 sps:$4 sm:$0xff]   ;;  %v319_v37 = vlaneseq  ;;  %vm588_vm0 = vcmask 1041409  }
  0x8b   : > { %v1986_v1 = vld [vmem:[%s2595_s24 + $0x204] ss:$8 sps:$4 sm:$0xff]   ;;  %1260 = vmatprep.subr.bf16.mxu1 %v1984_v0  ;;  %v1989_v3 = vld [vmem:[%s2595_s24 + $0x200] ss:$8 sps:$4 sm:$0xff]   ;;  %v1990_v4 = vld [vmem:[%s2595_s24 + $0x14] ss:$8 sps:$4 sm:$0xff]  }
  0x8c   : > { %1342 = vmatprep.subr.bf16.mxu0 %v1986_v1  ;;  %1261 = vmatpush1.bf16.msra.mxu1 %v1988_v2  ;;  %v1992_v5 = vld [vmem:[%s2595_s24 + $0x214] ss:$8 sps:$4 sm:$0xff]   ;;  %v1994_v6 = vld [vmem:[%s2595_s24 + $0x10] ss:$8 sps:$4 sm:$0xff]   ;;  %v1996_v8 = vld [vmem:[%s2595_s24 + $0x24] ss:$8 sps:$4 sm:$0xff]  }
  0x8d   : > { %1343 = vmatpush1.bf16.msra.mxu0 %v1989_v3  ;;  %1262 = vmatprep.subr.bf16.mxu1 %v1990_v4  ;;  %v1995_v7 = vld [vmem:[%s2595_s24 + $0x210] ss:$8 sps:$4 sm:$0xff]   ;;  %v1998_v9 = vld [vmem:[%s2595_s24 + $0x224] ss:$8 sps:$4 sm:$0xff]   ;;  %v2000_v10 = vld [vmem:[%s2595_s24 + $0x20] ss:$8 sps:$4 sm:$0xff]  }
  0x8e   : > { %1344 = vmatprep.subr.bf16.mxu0 %v1992_v5  ;;  %v2001_v11 = vld [vmem:[%s2595_s24 + $0x220] ss:$8 sps:$4 sm:$0xff]   ;;  %v2002_v12 = vld [vmem:[%s2595_s24 + $0x34] ss:$8 sps:$4 sm:$0xff]   ;;  %v2006_v14 = vld [vmem:[%s2595_s24 + $0x30] ss:$8 sps:$4 sm:$0xff]  }
  0x8f   : > { %v2004_v13 = vld [vmem:[%s2595_s24 + $0x234] ss:$8 sps:$4 sm:$0xff]   ;;  %v2007_v15 = vld [vmem:[%s2595_s24 + $0x230] ss:$8 sps:$4 sm:$0xff]   ;;  %v2008_v16 = vld [vmem:[%s2595_s24 + $0x44] ss:$8 sps:$4 sm:$0xff]  }
  0x90   : > { %1263 = vmatpush1.bf16.msra.mxu1 %v1994_v6  ;;  %v2010_v17 = vld [vmem:[%s2595_s24 + $0x244] ss:$8 sps:$4 sm:$0xff]   ;;  %v2012_v18 = vld [vmem:[%s2595_s24 + $0x40] ss:$8 sps:$4 sm:$0xff]   ;;  %v2014_v20 = vld [vmem:[%s2595_s24 + $0x54] ss:$8 sps:$4 sm:$0xff]  }
  0x91   : > { %1345 = vmatpush1.bf16.msra.mxu0 %v1995_v7  ;;  %1264 = vmatprep.subr.bf16.mxu1 %v1996_v8  ;;  %v2013_v19 = vld [vmem:[%s2595_s24 + $0x240] ss:$8 sps:$4 sm:$0xff]   ;;  %v2016_v21 = vld [vmem:[%s2595_s24 + $0x254] ss:$8 sps:$4 sm:$0xff]   ;;  %v2018_v22 = vld [vmem:[%s2595_s24 + $0x50] ss:$8 sps:$4 sm:$0xff]  }
  0x92   : > { %1346 = vmatprep.subr.bf16.mxu0 %v1998_v9  ;;  %v2019_v23 = vld [vmem:[%s2595_s24 + $0x250] ss:$8 sps:$4 sm:$0xff]   ;;  %v2020_v24 = vld [vmem:[%s2595_s24 + $0x64] ss:$8 sps:$4 sm:$0xff]   ;;  %v2024_v26 = vld [vmem:[%s2595_s24 + $0x60] ss:$8 sps:$4 sm:$0xff]  }
  0x93   : > { %v2022_v25 = vld [vmem:[%s2595_s24 + $0x264] ss:$8 sps:$4 sm:$0xff]   ;;  %v2025_v27 = vld [vmem:[%s2595_s24 + $0x260] ss:$8 sps:$4 sm:$0xff]   ;;  %v2026_v28 = vld [vmem:[%s2595_s24 + $0x74] ss:$8 sps:$4 sm:$0xff]  }
  0x94   : > { %1265 = vmatpush1.bf16.msra.mxu1 %v2000_v10  ;;  %v2028_v29 = vld [vmem:[%s2595_s24 + $0x274] ss:$8 sps:$4 sm:$0xff]   ;;  %v2030_v30 = vld [vmem:[%s2595_s24 + $0x70] ss:$8 sps:$4 sm:$0xff]   ;;  %v2032_v32 = vld [vmem:[%s2595_s24 + $0x84] ss:$8 sps:$4 sm:$0xff]  }
  0x95   : > { %1347 = vmatpush1.bf16.msra.mxu0 %v2001_v11  ;;  %1266 = vmatprep.subr.bf16.mxu1 %v2002_v12  ;;  %v2031_v31 = vld [vmem:[%s2595_s24 + $0x270] ss:$8 sps:$4 sm:$0xff]   ;;  %v2034_v33 = vld [vmem:[%s2595_s24 + $0x284] ss:$8 sps:$4 sm:$0xff]   ;;  %v2036_v34 = vld [vmem:[%s2595_s24 + $0x80] ss:$8 sps:$4 sm:$0xff]  }
  0x96   : > { %1348 = vmatprep.subr.bf16.mxu0 %v2004_v13  ;;  %v2037_v35 = vld [vmem:[%s2595_s24 + $0x280] ss:$8 sps:$4 sm:$0xff]   ;;  %v2038_v36 = vld [vmem:[%s2595_s24 + $0x94] ss:$8 sps:$4 sm:$0xff]   ;;  %v2042_v39 = vld [vmem:[%s2595_s24 + $0x90] ss:$8 sps:$4 sm:$0xff]  }
  0x97   : > { %v2040_v38 = vld [vmem:[%s2595_s24 + $0x294] ss:$8 sps:$4 sm:$0xff]   ;;  %v2043_v40 = vld [vmem:[%s2595_s24 + $0x290] ss:$8 sps:$4 sm:$0xff]   ;;  %v2044_v41 = vld [vmem:[%s2595_s24 + $0xa4] ss:$8 sps:$4 sm:$0xff]  }
  0x98   : > { %1267 = vmatpush1.bf16.msra.mxu1 %v2006_v14  ;;  %v2650_v42 = vshrl.u32 %v319_v37, 7  ;;  %v2046_v43 = vld [vmem:[%s2595_s24 + $0x2a4] ss:$8 sps:$4 sm:$0xff]   ;;  %v2048_v44 = vld [vmem:[%s2595_s24 + $0xa0] ss:$8 sps:$4 sm:$0xff]   ;;  %p305_p12 = scmp.lt.s32.totalorder %s2470_s30, 7 }
  0x99   : > { %1349 = vmatpush1.bf16.msra.mxu0 %v2007_v15  ;;  %1268 = vmatprep.subr.bf16.mxu1 %v2008_v16  ;;  %v2049_v45 = vld [vmem:[%s2595_s24 + $0x2a0] ss:$8 sps:$4 sm:$0xff]   ;;  %v2050_v46 = vld [vmem:[%s2595_s24 + $0xb4] ss:$8 sps:$4 sm:$0xff]   ;;  %v2054_v51 = vld [vmem:[%s2595_s24 + $0xb0] ss:$8 sps:$4 sm:$0xff]  }
  0x9a   : > { %1350 = vmatprep.subr.bf16.mxu0 %v2010_v17  ;;  %v2657_v47 = vsub.s32 1, %v2650_v42  ;;  %v2052_v48 = vld [vmem:[%s2595_s24 + $0x2b4] ss:$8 sps:$4 sm:$0xff]   ;;  %v341_v49 = vsub.s32 5, %v2650_v42  ;;  %v2662_v50 = vsub.s32 0, %v2650_v42  ;;  %v337_v53 = vsub.s32 4, %v2650_v42 }
  0x9b   : > { %v2055_v52 = vld [vmem:[%s2595_s24 + $0x2b0] ss:$8 sps:$4 sm:$0xff]   ;;  %v2056_v59 = vld [vmem:[%s2595_s24 + $0xc4] ss:$8 sps:$4 sm:$0xff]   ;;  %v333_v62 = vsub.s32 3, %v2650_v42  ;;  %v349_v12 = vsub.s32 7, %v2650_v42 }
  0x9c   : > { %1269 = vmatpush1.bf16.msra.mxu1 %v2012_v18  ;;  %v310_v54 = vld [vmem:[#allocation2] ss:$8 sm:$0xf]  ;;  %v2058_v60 = vld [vmem:[%s2595_s24 + $0x2c4] ss:$8 sps:$4 sm:$0xff]   ;;  %v329_v18 = vsub.s32 2, %v2650_v42 }
  0x9d   : > { %1351 = vmatpush1.bf16.msra.mxu0 %v2013_v19  ;;  %1270 = vmatprep.subr.bf16.mxu1 %v2014_v20  ;;  %v311_v55 = vld [vmem:[#allocation2] ss:$8 sm:$0xf0]  ;;  %v2062_v13 = vld [vmem:[%s2595_s24 + $0xd4] ss:$8 sps:$4 sm:$0xff]   ;;  %s2858_s30 = smov (!%p305_p12, %s2470_s30), 7 }
  0x9e   : > { %1352 = vmatprep.subr.bf16.mxu0 %v2016_v21  ;;  %v2667_v56 = vor.u32 %v311_v55, %v310_v54  ;;  %v314_v57 = vld [vmem:[#allocation2 + $0x40] ss:$8 sm:$0xf]  ;;  %v2064_v14 = vld [vmem:[%s2595_s24 + $0x2d4] ss:$8 sps:$4 sm:$0xff]   ;;  %s1735_s8 = sshll.u32 %s2858_s30, 1 }
  0x9f   : > { %v315_v58 = vld [vmem:[#allocation2 + $0x40] ss:$8 sm:$0xf0]  ;;  %v2076_v55 = vld [vmem:[%s2595_s24 + $0x2f4] ss:$8 sps:$4 sm:$0xff]   ;;  %s308_s20 = scalar_lea.vmem %s2832_s4, %s1735_s8 }
  0xa0   : > { %1271 = vmatpush1.bf16.msra.mxu1 %v2018_v22  ;;  %v2671_v61 = vor.u32 %v315_v58, %v314_v57  ;;  %v326_v63 = vrot.slane %v2667_v56, %v2657_v47  ;;  %v342_v0 = vrot.slane %v2667_v56, %v341_v49  ;;  %v322_v1 = vrot.slane %v2667_v56, %v2662_v50  ;;  %v2060_v7 = vld [vmem:[%s2595_s24 + $0xc0] ss:$8 sps:$4 sm:$0xff]  }
  0xa1   : > { %1353 = vmatpush1.bf16.msra.mxu0 %v2019_v23  ;;  %1272 = vmatprep.subr.bf16.mxu1 %v2020_v24  ;;  %v338_v2 = vrot.slane %v2667_v56, %v337_v53  ;;  %v2061_v8 = vld [vmem:[%s2595_s24 + $0x2c0] ss:$8 sps:$4 sm:$0xff]   ;;  %v2066_v23 = vld [vmem:[%s2595_s24 + $0xd0] ss:$8 sps:$4 sm:$0xff]  }
  0xa2   : > { %1354 = vmatprep.subr.bf16.mxu0 %v2022_v25  ;;  %v358_v3 = vrot.slane %v2671_v61, %v2657_v47  ;;  %v374_v4 = vrot.slane %v2671_v61, %v341_v49  ;;  %v354_v5 = vrot.slane %v2671_v61, %v2662_v50  ;;  %v370_v6 = vrot.slane %v2671_v61, %v337_v53 }
  0xa3   : > { %v400_v9 = vpack.c.bf16 %v326_v63, %v326_v63  ;;  %v404_v10 = vpack.c.bf16 %v342_v0, %v342_v0  ;;  %v399_v11 = vpack.c.bf16 %v322_v1, %v322_v1  ;;  %v403_v22 = vpack.c.bf16 %v338_v2, %v338_v2  ;;  %v2078_v1 = vld [vmem:[%s2595_s24 + $0xf0] ss:$8 sps:$4 sm:$0xff]  }
  0xa4   : > { %1273 = vmatpush1.bf16.msra.mxu1 %v2024_v26  ;;  %v408_v15 = vpack.c.bf16 %v358_v3, %v358_v3  ;;  %v412_v16 = vpack.c.bf16 %v374_v4, %v374_v4  ;;  %v407_v17 = vpack.c.bf16 %v354_v5, %v354_v5  ;;  %v345_v49 = vsub.s32 6, %v2650_v42 }
  0xa5   : > { %1355 = vmatpush1.bf16.msra.mxu0 %v2025_v27  ;;  %1274 = vmatprep.subr.bf16.mxu1 %v2026_v28  ;;  %v572_v19 = vunpack.c.l.b16 %v400_v9  ;;  %v576_v20 = vunpack.c.l.b16 %v404_v10  ;;  %v571_v21 = vunpack.c.l.b16 %v399_v11  ;;  %v411_v27 = vpack.c.bf16 %v370_v6, %v370_v6  ;;  %v2067_v28 = vld [vmem:[%s2595_s24 + $0x2d0] ss:$8 sps:$4 sm:$0xff]   ;;  %v2085_v10 = vld [vmem:[%s2595_s24 + $0x304] ss:$8 sps:$4 sm:$0xff]  }
  0xa6   : > { %1356 = vmatprep.subr.bf16.mxu0 %v2028_v29  ;;  %v580_v24 = vunpack.c.l.b16 %v408_v15  ;;  %v584_v25 = vunpack.c.l.b16 %v412_v16  ;;  %v579_v26 = vunpack.c.l.b16 %v407_v17  ;;  %v2068_v29 = vld [vmem:[%s2595_s24 + $0xe4] ss:$8 sps:$4 sm:$0xff]   ;;  %v330_v63 = vrot.slane %v2667_v56, %v329_v18  ;;  %v2079_v6 = vld [vmem:[%s2595_s24 + $0x2f0] ss:$8 sps:$4 sm:$0xff]   ;;  %v2080_v16 = vld [vmem:[%s2595_s24 + $0x100] ss:$8 sps:$4 sm:$0xff]  }
  0xa7   : > { %v362_v0 = vrot.slane %v2671_v61, %v329_v18  ;;  %v346_v4 = vrot.slane %v2667_v56, %v345_v49  ;;  %v378_v5 = vrot.slane %v2671_v61, %v345_v49  ;;  %v2113_v49 = vld [vmem:[%s2595_s24 + $0x350] ss:$8 sps:$4 sm:$0xff]  }
  0xa8   : > { %1275 = vmatpush1.bf16.msra.mxu1 %v2030_v30  ;;  %v575_v30 = vunpack.c.l.b16 %v403_v22  ;;  %v587_v37 = vrot.slane %v579_v26, 7  ;;  %v2088_v22 = vld [vmem:[%s2595_s24 + $0x114] ss:$8 sps:$4 sm:$0xff]  }
  0xa9   : > { %1357 = vmatpush1.bf16.msra.mxu0 %v2031_v31  ;;  %1276 = vmatprep.subr.bf16.mxu1 %v2032_v32  ;;  %v334_v31 = vrot.slane %v2667_v56, %v333_v62  ;;  %v366_v32 = vrot.slane %v2671_v61, %v333_v62  ;;  %v409_v9 = vpack.c.bf16 %v362_v0, %v362_v0  ;;  %v2136_v0 = vld [vmem:[%s2595_s24 + $0x194] ss:$8 sps:$4 sm:$0xff]  }
  0xaa   : > { %1358 = vmatprep.subr.bf16.mxu0 %v2034_v33  ;;  %v350_v33 = vrot.slane %v2667_v56, %v349_v12  ;;  %v589_v57 = vsel %vm588_vm0, %v587_v37, %v571_v21  ;;  %v2083_v21 = vld [vmem:[%s2595_s24 + $0x300] ss:$8 sps:$4 sm:$0xff]   ;;  %v2103_v37 = vld [vmem:[%s2595_s24 + $0x334] ss:$8 sps:$4 sm:$0xff]  }
  0xac   : > { %1277 = vmatpush1.bf16.msra.mxu1 %v2036_v34  ;;  %v2070_v34 = vld [vmem:[%s2595_s24 + $0x2e4] ss:$8 sps:$4 sm:$0xff]  }
  0xad   : > { %1359 = vmatpush1.bf16.msra.mxu0 %v2037_v35  ;;  %1278 = vmatprep.subr.bf16.mxu1 %v2038_v36  ;;  %v590_v35 = vrot.slane %v580_v24, 7  ;;  %v598_v36 = vrot.slane %v584_v25, 7  ;;  %v2091_v24 = vld [vmem:[%s2595_s24 + $0x314] ss:$8 sps:$4 sm:$0xff]  }
  0xae   : > { %1360 = vmatprep.subr.bf16.mxu0 %v2040_v38  ;;  %v583_v38 = vunpack.c.l.b16 %v411_v27 }
  0xb0   : > { %1279 = vmatpush1.bf16.msra.mxu1 %v2042_v39  ;;  %v402_v39 = vpack.c.bf16 %v334_v31, %v334_v31  ;;  %v2089_v31 = vld [vmem:[%s2595_s24 + $0x310] ss:$8 sps:$4 sm:$0xff]  }
  0xb1   : > { %1361 = vmatpush1.bf16.msra.mxu0 %v2043_v40  ;;  %1280 = vmatprep.subr.bf16.mxu1 %v2044_v41  ;;  %v410_v40 = vpack.c.bf16 %v366_v32, %v366_v32  ;;  %v382_v41 = vrot.slane %v2671_v61, %v349_v12  ;;  %v405_v12 = vpack.c.bf16 %v346_v4, %v346_v4  ;;  %v581_v61 = vunpack.c.l.b16 %v409_v9  ;;  %v2094_v32 = vld [vmem:[%s2595_s24 + $0x124] ss:$8 sps:$4 sm:$0xff]   ;;  %v2151_v9 = vld [vmem:[%s2595_s24 + $0x3b4] ss:$8 sps:$4 sm:$0xff]  }
  0xb2   : > { %1362 = vmatprep.subr.bf16.mxu0 %v2046_v43  ;;  %v406_v43 = vpack.c.bf16 %v350_v33, %v350_v33  ;;  %v574_v58 = vunpack.c.l.b16 %v402_v39  ;;  %v2097_v33 = vld [vmem:[%s2595_s24 + $0x324] ss:$8 sps:$4 sm:$0xff]   ;;  %v2101_v39 = vld [vmem:[%s2595_s24 + $0x330] ss:$8 sps:$4 sm:$0xff]  }
  0xb3   : > { %v2142_v4 = vld [vmem:[%s2595_s24 + $0x1a4] ss:$8 sps:$4 sm:$0xff]  }
  0xb4   : > { %1281 = vmatpush1.bf16.msra.mxu1 %v2048_v44  ;;  %v2072_v44 = vld [vmem:[%s2595_s24 + $0xe0] ss:$8 sps:$4 sm:$0xff]   ;;  %v578_v62 = vunpack.c.l.b16 %v406_v43 }
  0xb5   : > { %1363 = vmatpush1.bf16.msra.mxu0 %v2049_v45  ;;  %1282 = vmatprep.subr.bf16.mxu1 %v2050_v46  ;;  %v591_v45 = vsel %vm588_vm0, %v590_v35, %v572_v19  ;;  %v599_v46 = vsel %vm588_vm0, %v598_v36, %v576_v20  ;;  %v577_v19 = vunpack.c.l.b16 %v405_v12  ;;  %v2095_v35 = vld [vmem:[%s2595_s24 + $0x320] ss:$8 sps:$4 sm:$0xff]   ;;  %v2100_v36 = vld [vmem:[%s2595_s24 + $0x134] ss:$8 sps:$4 sm:$0xff]   ;;  %v2154_v12 = vld [vmem:[%s2595_s24 + $0x1c4] ss:$8 sps:$4 sm:$0xff]  }
  0xb6   : > { %1364 = vmatprep.subr.bf16.mxu0 %v2052_v48  ;;  %v596_v48 = vrot.slane %v583_v38, 7  ;;  %v605_v53 = vpack.c.b16 %v591_v45, %v591_v45  ;;  %v609_v54 = vpack.c.b16 %v599_v46, %v599_v46  ;;  %v2098_v38 = vld [vmem:[%s2595_s24 + $0x130] ss:$8 sps:$4 sm:$0xff]   ;;  %v2104_v43 = vld [vmem:[%s2595_s24 + $0x140] ss:$8 sps:$4 sm:$0xff]  }
  0xb7   : > { %v2112_v45 = vld [vmem:[%s2595_s24 + $0x154] ss:$8 sps:$4 sm:$0xff]  }
  0xb8   : > { %1283 = vmatpush1.bf16.msra.mxu1 %v2054_v51  ;;  %v2073_v51 = vld [vmem:[%s2595_s24 + $0x2e0] ss:$8 sps:$4 sm:$0xff]   ;;  %1292 = vmatprep.mubr.bf16.mxu1 %v605_v53  ;;  %v597_v42 = vsel %vm588_vm0, %v596_v48, %v575_v30  ;;  %v2115_v46 = vld [vmem:[%s2595_s24 + $0x354] ss:$8 sps:$4 sm:$0xff]   ;;  %v2110_v48 = vld [vmem:[%s2595_s24 + $0x150] ss:$8 sps:$4 sm:$0xff]  }
  0xb9   : > { %1365 = vmatpush1.bf16.msra.mxu0 %v2055_v52  ;;  %1284 = vmatprep.subr.bf16.mxu1 %v2056_v59  ;;  %v2074_v52 = vld [vmem:[%s2595_s24 + $0xf4] ss:$8 sps:$4 sm:$0xff]   ;;  %v582_v59 = vunpack.c.l.b16 %v410_v40  ;;  %v608_v56 = vpack.c.b16 %v597_v42, %v597_v42  ;;  %v2106_v40 = vld [vmem:[%s2595_s24 + $0x144] ss:$8 sps:$4 sm:$0xff]   ;;  %v2116_v53 = vld [vmem:[%s2595_s24 + $0x160] ss:$8 sps:$4 sm:$0xff]  }
  0xba   : > { %1366 = vmatprep.subr.bf16.mxu0 %v2058_v60  ;;  %v414_v60 = vpack.c.bf16 %v382_v41, %v382_v41  ;;  %1374 = vmatprep.mubr.bf16.mxu0 %v609_v54  ;;  %v2109_v41 = vld [vmem:[%s2595_s24 + $0x344] ss:$8 sps:$4 sm:$0xff]   ;;  %v2119_v54 = vld [vmem:[%s2595_s24 + $0x360] ss:$8 sps:$4 sm:$0xff]  }
  0xbb   : > { %v594_v2 = vrot.slane %v582_v59, 7  ;;  %v2125_v59 = vld [vmem:[%s2595_s24 + $0x370] ss:$8 sps:$4 sm:$0xff]   ;;  %v2133_v42 = vld [vmem:[%s2595_s24 + $0x384] ss:$8 sps:$4 sm:$0xff]  }
  0xbc   : > { %1285 = vmatpush1.bf16.msra.mxu1 %v2060_v7  ;;  %v586_v3 = vunpack.c.l.b16 %v414_v60  ;;  %v2082_v7 = vld [vmem:[%s2595_s24 + $0x104] ss:$8 sps:$4 sm:$0xff]  }
  0xbd   : > { %1367 = vmatpush1.bf16.msra.mxu0 %v2061_v8  ;;  %1286 = vmatprep.subr.bf16.mxu1 %v2062_v13  ;;  %v401_v8 = vpack.c.bf16 %v330_v63, %v330_v63  ;;  %v413_v13 = vpack.c.bf16 %v378_v5, %v378_v5  ;;  %v595_v17 = vsel %vm588_vm0, %v594_v2, %v574_v58  ;;  %v2122_v58 = vld [vmem:[%s2595_s24 + $0x170] ss:$8 sps:$4 sm:$0xff]   ;;  %v2130_v60 = vld [vmem:[%s2595_s24 + $0x184] ss:$8 sps:$4 sm:$0xff]   ;;  %v2131_v63 = vld [vmem:[%s2595_s24 + $0x380] ss:$8 sps:$4 sm:$0xff]  }
  0xbe   : > { %1368 = vmatprep.subr.bf16.mxu0 %v2064_v14  ;;  %v602_v11 = vrot.slane %v586_v3, 7  ;;  %v604_v14 = vpack.c.b16 %v589_v57, %v589_v57  ;;  %v607_v26 = vpack.c.b16 %v595_v17, %v595_v17  ;;  %v2127_v57 = vld [vmem:[%s2595_s24 + $0x374] ss:$8 sps:$4 sm:$0xff]   ;;  %v2134_v2 = vld [vmem:[%s2595_s24 + $0x190] ss:$8 sps:$4 sm:$0xff]  }
  0xbf   : > { %v573_v15 = vunpack.c.l.b16 %v401_v8  ;;  %v585_v20 = vunpack.c.l.b16 %v413_v13  ;;  %v2137_v3 = vld [vmem:[%s2595_s24 + $0x390] ss:$8 sps:$4 sm:$0xff]   ;;  %v2145_v5 = vld [vmem:[%s2595_s24 + $0x3a4] ss:$8 sps:$4 sm:$0xff]   ;;  %v2148_v8 = vld [vmem:[%s2595_s24 + $0x1b4] ss:$8 sps:$4 sm:$0xff]  }
  0xc0   : > { %1287 = vmatpush1.bf16.msra.mxu1 %v2066_v23  ;;  %v603_v18 = vsel %vm588_vm0, %v602_v11, %v578_v62  ;;  %v592_v23 = vrot.slane %v581_v61, 7  ;;  %v2128_v62 = vld [vmem:[%s2595_s24 + $0x180] ss:$8 sps:$4 sm:$0xff]   ;;  %v2149_v11 = vld [vmem:[%s2595_s24 + $0x3b0] ss:$8 sps:$4 sm:$0xff]  }
  0xc1   : > { %1369 = vmatpush1.bf16.msra.mxu0 %v2067_v28  ;;  %1288 = vmatprep.subr.bf16.mxu1 %v2068_v29  ;;  %v600_v25 = vrot.slane %v585_v20, 7  ;;  %v611_v27 = vpack.c.b16 %v603_v18, %v603_v18  ;;  %v2086_v29 = vld [vmem:[%s2595_s24 + $0x110] ss:$8 sps:$4 sm:$0xff]   ;;  %v2157_v13 = vld [vmem:[%s2595_s24 + $0x3c4] ss:$8 sps:$4 sm:$0xff]  }
  0xc2   : > { %1370 = vmatprep.subr.bf16.mxu0 %v2070_v34  ;;  %v2724_v28 = vsel %vm588_vm0, %v592_v23, %v573_v15  ;;  %v2092_v34 = vld [vmem:[%s2595_s24 + $0x120] ss:$8 sps:$4 sm:$0xff]   ;;  %v2160_v15 = vld [vmem:[%s2595_s24 + $0x1d4] ss:$8 sps:$4 sm:$0xff]   ;;  %v2161_v17 = vld [vmem:[%s2595_s24 + $0x3d0] ss:$8 sps:$4 sm:$0xff]  }
  0xc3   : > { %v2728_v30 = vsel %vm588_vm0, %v600_v25, %v577_v19  ;;  %v2163_v61 = vld [vmem:[%s2595_s24 + $0x3d4] ss:$8 sps:$4 sm:$0xff]   ;;  %v2166_v18 = vld [vmem:[%s2595_s24 + $0x1e4] ss:$8 sps:$4 sm:$0xff]   ;;  %v2164_v20 = vld [vmem:[%s2595_s24 + $0x1e0] ss:$8 sps:$4 sm:$0xff]  }
  0xc4   : > { %1289 = vmatpush1.bf16.msra.mxu1 %v2072_v44  ;;  %v2107_v44 = vld [vmem:[%s2595_s24 + $0x340] ss:$8 sps:$4 sm:$0xff]   ;;  %v2169_v19 = vld [vmem:[%s2595_s24 + $0x3e4] ss:$8 sps:$4 sm:$0xff]   ;;  %v2175_v23 = vld [vmem:[%s2595_s24 + $0x3f4] ss:$8 sps:$4 sm:$0xff]  }
  0xc5   : > { %1371 = vmatpush1.bf16.msra.mxu0 %v2073_v51  ;;  %1290 = vmatprep.subr.bf16.mxu1 %v2074_v52  ;;  %v2118_v51 = vld [vmem:[%s2595_s24 + $0x164] ss:$8 sps:$4 sm:$0xff]   ;;  %v2173_v25 = vld [vmem:[%s2595_s24 + $0x3f0] ss:$8 sps:$4 sm:$0xff]  }
  0xc6   : > { %1372 = vmatprep.subr.bf16.mxu0 %v2076_v55  ;;  %v2121_v52 = vld [vmem:[%s2595_s24 + $0x364] ss:$8 sps:$4 sm:$0xff]   ;;  %v2124_v55 = vld [vmem:[%s2595_s24 + $0x174] ss:$8 sps:$4 sm:$0xff]  }
  0xc8   : > { %1291 = vmatpush1.bf16.msra.mxu1 %v2078_v1  ;;  %v2139_v1 = vld [vmem:[%s2595_s24 + $0x394] ss:$8 sps:$4 sm:$0xff]  }
  0xc9   : > { %1373 = vmatpush1.bf16.msra.mxu0 %v2079_v6  ;;  %1301 = vmatprep.subr.bf16.mxu1 %v2082_v7  ;;  %v2140_v6 = vld [vmem:[%s2595_s24 + $0x1a0] ss:$8 sps:$4 sm:$0xff]  }
  0xca   : > { %1383 = vmatprep.subr.bf16.mxu0 %v2085_v10  ;;  %v2143_v7 = vld [vmem:[%s2595_s24 + $0x3a0] ss:$8 sps:$4 sm:$0xff]   ;;  %v2146_v10 = vld [vmem:[%s2595_s24 + $0x1b0] ss:$8 sps:$4 sm:$0xff]  }
  0xcb   : > { %1293 = vmatmul.mubr.bf16.vlgmr.msra.gmra.mrb[0].mxu1 %v604_v14  ;;  %v2152_v14 = vld [vmem:[%s2595_s24 + $0x1c0] ss:$8 sps:$4 sm:$0xff]  }
  0xcc   : > { %1375 = vmatmul.mubr.bf16.vlgmr.msra.gmra.mrb[0].mxu0 %v608_v56  ;;  %1302 = vmatpush1.bf16.msra.mxu1 %v2080_v16  ;;  %v2155_v56 = vld [vmem:[%s2595_s24 + $0x3c0] ss:$8 sps:$4 sm:$0xff]   ;;  %v2158_v16 = vld [vmem:[%s2595_s24 + $0x1d0] ss:$8 sps:$4 sm:$0xff]  }
  0xcd   : > { %1384 = vmatpush1.bf16.msra.mxu0 %v2083_v21  ;;  %1303 = vmatprep.subr.bf16.mxu1 %v2088_v22  ;;  %v2167_v21 = vld [vmem:[%s2595_s24 + $0x3e0] ss:$8 sps:$4 sm:$0xff]   ;;  %v2172_v22 = vld [vmem:[%s2595_s24 + $0x1f4] ss:$8 sps:$4 sm:$0xff]  }
  0xce   : > { %1385 = vmatprep.subr.bf16.mxu0 %v2091_v24  ;;  %1333 = vmatprep.mubr.bf16.mxu1 %v607_v26  ;;  %v2170_v24 = vld [vmem:[%s2595_s24 + $0x1f0] ss:$8 sps:$4 sm:$0xff]   ;;  %v2176_v26 = vld [vmem:[%s2603_s5 + $0x40] sm:$0xff]  }
  0xcf   : > { %1415 = vmatprep.mubr.bf16.mxu0 %v611_v27  ;;  %v606_v27 = vpack.c.b16 %v2724_v28, %v2724_v28  ;;  %v2180_v28 = vld [vmem:[%s2603_s5 + $0x50] sm:$0xff]  }
  0xd0   : > { %1304 = vmatpush1.bf16.msra.mxu1 %v2086_v29  ;;  %v610_v29 = vpack.c.b16 %v2728_v30, %v2728_v30  ;;  %v2182_v30 = vld [vmem:[%s2603_s5 + $0x58] sm:$0xff]  }
  0xd1   : > { %1386 = vmatpush1.bf16.msra.mxu0 %v2089_v31  ;;  %1305 = vmatprep.subr.bf16.mxu1 %v2094_v32  ;;  %v2177_v31 = vld [vmem:[%s2603_s5] sm:$0xff]   ;;  %v2178_v32 = vld [vmem:[%s2603_s5 + $0x48] sm:$0xff]  }
  0xd2   : > { %1387 = vmatprep.subr.bf16.mxu0 %v2097_v33  ;;  %v2179_v33 = vld [vmem:[%s2603_s5 + $0x8] sm:$0xff]  }
  0xd4   : > { %1306 = vmatpush1.bf16.msra.mxu1 %v2092_v34  ;;  %v2181_v34 = vld [vmem:[%s2603_s5 + $0x10] sm:$0xff]  }
  0xd5   : > { %1388 = vmatpush1.bf16.msra.mxu0 %v2095_v35  ;;  %1307 = vmatprep.subr.bf16.mxu1 %v2100_v36  ;;  %v2183_v35 = vld [vmem:[%s2603_s5 + $0x18] sm:$0xff]   ;;  %v2184_v36 = vld [vmem:[%s2603_s5 + $0x60] sm:$0xff]  }
  0xd6   : > { %1389 = vmatprep.subr.bf16.mxu0 %v2103_v37  ;;  %v2185_v37 = vld [vmem:[%s2603_s5 + $0x20] sm:$0xff]  }
  0xd8   : > { %1308 = vmatpush1.bf16.msra.mxu1 %v2098_v38  ;;  %v2186_v38 = vld [vmem:[%s2603_s5 + $0x68] sm:$0xff]  }
  0xd9   : > { %1390 = vmatpush1.bf16.msra.mxu0 %v2101_v39  ;;  %1309 = vmatprep.subr.bf16.mxu1 %v2106_v40  ;;  %v2187_v39 = vld [vmem:[%s2603_s5 + $0x28] sm:$0xff]   ;;  %v2188_v40 = vld [vmem:[%s2603_s5 + $0x70] sm:$0xff]  }
  0xda   : > { %1391 = vmatprep.subr.bf16.mxu0 %v2109_v41  ;;  %v2189_v41 = vld [vmem:[%s2603_s5 + $0x30] sm:$0xff]  }
  0xdc   : > { %1310 = vmatpush1.bf16.msra.mxu1 %v2104_v43  ;;  %v2190_v43 = vld [vmem:[%s2603_s5 + $0x78] sm:$0xff]  }
  0xdd   : > { %1392 = vmatpush1.bf16.msra.mxu0 %v2107_v44  ;;  %1311 = vmatprep.subr.bf16.mxu1 %v2112_v45  ;;  %v2191_v44 = vld [vmem:[%s2603_s5 + $0x38] sm:$0xff]  }
  0xde   : > { %1393 = vmatprep.subr.bf16.mxu0 %v2115_v46  ;;  %v543_v45 = vld [vmem:[%s2601_s29] sm:$0x3] }
  0xdf   : > { %v548_v46 = vrot.slane %v543_v45, %v2662_v50 }
  0xe0   : > { %1312 = vmatpush1.bf16.msra.mxu1 %v2110_v48  ;;  %v552_v48 = vrot.slane %v543_v45, %v2657_v47 }
  0xe1   : > { %1394 = vmatpush1.bf16.msra.mxu0 %v2113_v49  ;;  %1313 = vmatprep.subr.bf16.mxu1 %v2118_v51 }
  0xe2   : > { %1395 = vmatprep.subr.bf16.mxu0 %v2121_v52 }
  0xe4   : > { %1314 = vmatpush1.bf16.msra.mxu1 %v2116_v53 }
  0xe5   : > { %1396 = vmatpush1.bf16.msra.mxu0 %v2119_v54  ;;  %1315 = vmatprep.subr.bf16.mxu1 %v2124_v55 }
  0xe6   : > { %1397 = vmatprep.subr.bf16.mxu0 %v2127_v57 }
  0xe8   : > { %1316 = vmatpush1.bf16.msra.mxu1 %v2122_v58 }
  0xe9   : > { %1398 = vmatpush1.bf16.msra.mxu0 %v2125_v59  ;;  %1317 = vmatprep.subr.bf16.mxu1 %v2130_v60 }
  0xea   : > { %1399 = vmatprep.subr.bf16.mxu0 %v2133_v42 }
  0xec   : > { %1318 = vmatpush1.bf16.msra.mxu1 %v2128_v62 }
  0xed   : > { %1400 = vmatpush1.bf16.msra.mxu0 %v2131_v63  ;;  %1319 = vmatprep.subr.bf16.mxu1 %v2136_v0 }
  0xee   : > { %1401 = vmatprep.subr.bf16.mxu0 %v2139_v1 }
  0xf0   : > { %1320 = vmatpush1.bf16.msra.mxu1 %v2134_v2 }
  0xf1   : > { %1402 = vmatpush1.bf16.msra.mxu0 %v2137_v3  ;;  %1321 = vmatprep.subr.bf16.mxu1 %v2142_v4 }
  0xf2   : > { %1403 = vmatprep.subr.bf16.mxu0 %v2145_v5 }
  0xf4   : > { %1322 = vmatpush1.bf16.msra.mxu1 %v2140_v6 }
  0xf5   : > { %1404 = vmatpush1.bf16.msra.mxu0 %v2143_v7  ;;  %1323 = vmatprep.subr.bf16.mxu1 %v2148_v8 }
  0xf6   : > { %1405 = vmatprep.subr.bf16.mxu0 %v2151_v9 }
  0xf8   : > { %1324 = vmatpush1.bf16.msra.mxu1 %v2146_v10 }
  0xf9   : > { %1406 = vmatpush1.bf16.msra.mxu0 %v2149_v11  ;;  %1325 = vmatprep.subr.bf16.mxu1 %v2154_v12 }
  0xfa   : > { %1407 = vmatprep.subr.bf16.mxu0 %v2157_v13 }
  0xfc   : > { %1326 = vmatpush1.bf16.msra.mxu1 %v2152_v14 }
  0xfd   : > { %1408 = vmatpush1.bf16.msra.mxu0 %v2155_v56  ;;  %1327 = vmatprep.subr.bf16.mxu1 %v2160_v15 }
  0xfe   : > { %1409 = vmatprep.subr.bf16.mxu0 %v2163_v61 }
 0x100   : > { %1328 = vmatpush1.bf16.msra.mxu1 %v2158_v16 }
 0x101   : > { %1410 = vmatpush1.bf16.msra.mxu0 %v2161_v17  ;;  %1329 = vmatprep.subr.bf16.mxu1 %v2166_v18 }
 0x102   : > { %1411 = vmatprep.subr.bf16.mxu0 %v2169_v19 }
 0x104   : > { %1330 = vmatpush1.bf16.msra.mxu1 %v2164_v20 }
 0x105   : > { %1412 = vmatpush1.bf16.msra.mxu0 %v2167_v21  ;;  %1331 = vmatprep.subr.bf16.mxu1 %v2172_v22 }
 0x106   : > { %1413 = vmatprep.subr.bf16.mxu0 %v2175_v23 }
 0x108   : > { %1332 = vmatpush1.bf16.msra.mxu1 %v2170_v24 }
 0x109   : > { %1414 = vmatpush1.bf16.msra.mxu0 %v2173_v25  ;;  %1885 = vmatprep.subr.bf16.mxu1 %v2176_v26 }
 0x10b   : > { %1334 = vmatmul.mubr.bf16.vlgmr.msra.gmra.mrb[0].mxu1 %v606_v27 }
 0x10c   : > { %1416 = vmatmul.mubr.bf16.vlgmr.msra.gmra.mrb[0].mxu0 %v610_v29  ;;  %1886 = vmatpush3.bf16.msra.mxu1 %v2177_v31 }
 0x10d   : > { %1887 = vmatprep.subr.bf16.mxu1 %v2178_v32 }
 0x110   : > { %1888 = vmatpush3.bf16.msra.mxu1 %v2179_v33 }
 0x111   : > { %1889 = vmatprep.subr.bf16.mxu1 %v2180_v28 }
 0x114   : > { %1890 = vmatpush3.bf16.msra.mxu1 %v2181_v34 }
 0x115   : > { %1891 = vmatprep.subr.bf16.mxu1 %v2182_v30 }
 0x118   : > { %1892 = vmatpush3.bf16.msra.mxu1 %v2183_v35 }
 0x119   : > { %1893 = vmatprep.subr.bf16.mxu1 %v2184_v36 }
 0x11c   : > { %1894 = vmatpush3.bf16.msra.mxu1 %v2185_v37 }
 0x11d   : > { %1895 = vmatprep.subr.bf16.mxu1 %v2186_v38 }
 0x120   : > { %1896 = vmatpush3.bf16.msra.mxu1 %v2187_v39 }
 0x121   : > { %1897 = vmatprep.subr.bf16.mxu1 %v2188_v40 }
 0x124   : > { %1898 = vmatpush3.bf16.msra.mxu1 %v2189_v41 }
 0x125   : > { %1899 = vmatprep.subr.bf16.mxu1 %v2190_v43 }
 0x128   : > { %1900 = vmatpush3.bf16.msra.mxu1 %v2191_v44 }
 0x1de   : > { %v1335_v49 = vpop.f32.mrb[0].mxu1 }
 0x1df   : > { %v1417_v51 = vpop.f32.mrb[0].mxu0  ;;  %v1907_v52 = vadd.f32 %v1335_v49, %v548_v46  ;;  %v1337_v53 = vpop.f32.mrb[1].mxu1 }
 0x1e0   : > { %v1419_v54 = vpop.f32.mrb[1].mxu0  ;;  %v1909_v55 = vadd.f32 %v1337_v53, %v552_v48  ;;  %v1339_v57 = vpop.f32.mrb[2].mxu1 }
 0x1e1   : > { %v1421_v58 = vpop.f32.mrb[2].mxu0  ;;  %v1908_v59 = vadd.f32 %v1907_v52, %v1417_v51  ;;  %v1340_v60 = vpop.f32.mrb[3].mxu1 }
 0x1e2   : > { %v1422_v42 = vpop.f32.mrb[3].mxu0  ;;  %v1910_v62 = vadd.f32 %v1909_v55, %v1419_v54 }
 0x1e3   : > { %v1424_v63 = vmax.f32 %v1908_v59, 0.0 }
 0x1e4   : > { %v1425_v0 = vmax.f32 %v1910_v62, 0.0 }
 0x1e5   : > { %v1426_v50 = vpack.c.bf16 %v1424_v63, %v1424_v63 }
 0x1e6   : > { %v1427_v1 = vpack.c.bf16 %v1425_v0, %v1425_v0 }
 0x1e8   : > { %1588 = vmatprep.mubr.bf16.mxu1 %v1427_v1 }
 0x1e9   : > { %1589 = vmatmul.mubr.bf16.vlgmr.msra.gmra.mrb[4].mxu1 %v1426_v50 }
 0x2bc   : > { %v1901_v47 = vpop.f32.mrb[4].mxu1 }
 0x2bd   : > { %v1902_v2 = vpop.f32.mrb[5].mxu1 }
 0x2be   : > { %v1903_v3 = vadd.f32 %v1902_v2, %v1901_v47  ;;  %v1904_v4 = vpop.f32.mrb[6].mxu1 }
 0x2bf   : > { %v1905_v5 = vpop.f32.mrb[7].mxu1 }
 0x2c0   : > { %1596 = vst [vmem:[%s308_s20] sm:$0x3] %v1903_v3 }
 0x2c1 PF: > { %p18_p0 = scmp.ge.s32.totalorder %s2409_s19, 10   ;;  %s2853_s15 = smov %s2344_s16 }
 0x2c2   : > { %s2854_s16 = smov %s2348_s17  ;;  %s2855_s17 = smov %s2418_s22 }
 0x2c3   : > { %s2856_s18 = smov %s2409_s19  ;;  %20 = sbr.rel (!%p18_p0) target bundleno = 6 (0x6), region = 106 }
 0x2ca   :  { %1616 = vsyncpa [#allocation3], 1 }
 0x2cb   :  { %1618 = vsyncpa [#allocation3 + $0x1], 1 }
 0x2cc   :  { %1619 = vsyncpa [#allocation5], 1 }
 0x2cd   :  { %1621 = vsyncpa [#allocation5 + $0x1], 1 }
 0x2ce   :  { %1622 = vsyncpa [#allocation8], 1 }
 0x2cf   :  { %1624 = vsyncpa [#allocation8 + $0x1], 1 }

</bundles_post_ra>
